<compile_context>
chip_gen: v5e
topology: v5e:2x2
jax: 0.10.0
libtpu: 0.0.40
codegen_flags: <defaults>
</compile_context>

<pallas_src>
import functools

import jax
import jax.numpy as jnp
from jax.experimental import pallas as pl
from jax.experimental.pallas import tpu as pltpu

_LANE = 128


def _residual_mlp_kernel(x_ref, w1_ref, b1_ref, w2_ref, b2_ref, o_ref, acc_ref):
    """One (tile_m, D) row tile; H-chunk `h` of fn(x) = GELU(x@W1+b1)@W2+b2.

    Grid = (row_tiles, h_chunks).  The output block index is constant across
    the h axis, so acc_ref accumulates the second matmul across H chunks; b2
    and the residual x are added in the epilogue on the last chunk.
    """
    h_idx = pl.program_id(1)

    @pl.when(h_idx == 0)
    def _init():
        acc_ref[...] = jnp.zeros_like(acc_ref)

    xv = x_ref[...]                       # single load of the x tile
    x_bf = xv.astype(jnp.bfloat16)        # MXU input (bf16, f32 accumulation)

    # matmul1 chunk -> bias + tanh GELU (EUP) -> matmul2 chunk accumulate.
    h = jnp.dot(x_bf, w1_ref[...], preferred_element_type=jnp.float32)
    h = jax.nn.gelu(h + b1_ref[...], approximate=True)
    acc_ref[...] += jnp.dot(h.astype(jnp.bfloat16), w2_ref[...],
                            preferred_element_type=jnp.float32)

    @pl.when(h_idx == pl.num_programs(1) - 1)
    def _finalize():
        y = acc_ref[...] + b2_ref[...] + xv.astype(jnp.float32)
        o_ref[...] = y.astype(o_ref.dtype)


def _vmem_limit_bytes(needed):
    # Generation-aware VMEM request: <= ~80% of physical capacity so Mosaic
    # keeps room for internal scratch / spill slots.  Fallback assumes the
    # smallest per-TC VMEM (v7x, 64 MiB) if the query is unavailable.
    cap_phys = 64 * 1024 * 1024
    try:
        info = pltpu.get_tpu_info()
        cap_phys = int(getattr(info, "vmem_capacity_bytes", cap_phys))
    except Exception:
        pass
    cap = int(0.8 * cap_phys)
    return int(min(max(int(1.5 * needed), 32 * 1024 * 1024), cap))


def _build_call(M_pad, D_pad, H_pad, tile_m, tile_h, x_dtype, out_dtype):
    m_tiles = M_pad // tile_m
    h_tiles = H_pad // tile_h

    in_specs = [
        pl.BlockSpec((tile_m, D_pad), lambda i, h: (i, 0)),   # x row tile (kept across h)
        pl.BlockSpec((D_pad, tile_h), lambda i, h: (0, h)),   # W1 column chunk
        pl.BlockSpec((1, tile_h),     lambda i, h: (0, h)),   # b1 chunk
        pl.BlockSpec((tile_h, D_pad), lambda i, h: (h, 0)),   # W2 row chunk
        pl.BlockSpec((1, D_pad),      lambda i, h: (0, 0)),   # b2
    ]
    out_specs = pl.BlockSpec((tile_m, D_pad), lambda i, h: (i, 0))

    x_bytes = jnp.dtype(x_dtype).itemsize
    o_bytes = jnp.dtype(out_dtype).itemsize
    needed = (
        2 * tile_m * D_pad * x_bytes        # x tile (double-buffered)
        + 2 * D_pad * tile_h * 2            # W1 chunk (bf16)
        + 2 * tile_h * 4                    # b1 chunk (f32)
        + 2 * tile_h * D_pad * 2            # W2 chunk (bf16)
        + 2 * D_pad * 4                     # b2 (f32)
        + 2 * tile_m * D_pad * o_bytes      # out tile
        + tile_m * D_pad * 4                # f32 accumulator scratch
        + tile_m * tile_h * 4               # f32 hidden chunk intermediate
    )
    vmem_limit = _vmem_limit_bytes(needed)

    weight_bytes = 2 * (D_pad * H_pad + H_pad * D_pad)        # bf16 W1 + W2
    cost = pl.CostEstimate(
        flops=4 * M_pad * D_pad * H_pad,                      # two matmuls
        transcendentals=M_pad * H_pad,                        # tanh GELU
        bytes_accessed=(M_pad * D_pad * (x_bytes + o_bytes)
                        + m_tiles * weight_bytes
                        + (H_pad + D_pad) * 4),
    )

    return pl.pallas_call(
        _residual_mlp_kernel,
        out_shape=jax.ShapeDtypeStruct((M_pad, D_pad), out_dtype),
        grid_spec=pltpu.PrefetchScalarGridSpec(
            num_scalar_prefetch=0,
            grid=(m_tiles, h_tiles),        # reduction (H) axis last
            in_specs=in_specs,
            out_specs=out_specs,
            scratch_shapes=[pltpu.VMEM((tile_m, D_pad), jnp.float32)],
        ),
        compiler_params=pltpu.CompilerParams(
            dimension_semantics=("parallel", "arbitrary"),
            vmem_limit_bytes=vmem_limit,
        ),
        cost_estimate=cost,
    )


@functools.partial(jax.jit, static_argnames=("tile_m", "tile_h"))
def _forward(x, w1, b1, w2, b2, *, tile_m, tile_h):
    B, N, D = x.shape
    H = w1.shape[1]
    M = B * N

    M_pad = tile_m * pl.cdiv(M, tile_m)
    D_pad = _LANE * pl.cdiv(D, _LANE)     # lane-dense output, fully-fed MXU
    H_pad = tile_h * pl.cdiv(H, tile_h)

    # Zero padding is numerically inert: padded x columns / W rows / biases are
    # zero, GELU(0)=0, and padded output rows/columns are sliced away.
    x2 = x.reshape(M, D)
    x2 = jnp.pad(x2, ((0, M_pad - M), (0, D_pad - D)))

    w1p = jnp.pad(w1, ((0, D_pad - D), (0, H_pad - H))).astype(jnp.bfloat16)
    w2p = jnp.pad(w2, ((0, H_pad - H), (0, D_pad - D))).astype(jnp.bfloat16)
    b1p = jnp.pad(b1, (0, H_pad - H)).reshape(1, H_pad).astype(jnp.float32)
    b2p = jnp.pad(b2, (0, D_pad - D)).reshape(1, D_pad).astype(jnp.float32)

    call = _build_call(M_pad, D_pad, H_pad, tile_m, tile_h, x.dtype, x.dtype)
    out2 = call(x2, w1p, b1p, w2p, b2p)
    return out2[:M, :D].reshape(B, N, D)


def _pick_tile_h(H):
    """Largest of {512, 384, 256, 128} dividing H padded to a 128 multiple."""
    H_pad = _LANE * pl.cdiv(H, _LANE)
    for cand in (512, 384, 256, 128):
        if H_pad % cand == 0:
            return cand
    return H_pad


def residual_add_block(x, w1, b1, w2, b2, *, tile_m=None, tile_h=None):
    """x: (B, N, D) -> x + MLP(x), fused in a single Pallas TPU kernel."""
    B, N, D = x.shape
    H = w1.shape[1]
    M = B * N

    if tile_m is None:
        tile_m = 256                       # amortizes grid-step overhead on all gens
    # Keep >= 2 row tiles when possible so v7x's two TensorCores both get work
    # (megacore sharding of the "parallel" row axis).
    while tile_m > 64 and pl.cdiv(M, tile_m) < 2:
        tile_m //= 2
    tile_m = max(8 * pl.cdiv(tile_m, 8), 8)

    if tile_h is None:
        tile_h = _pick_tile_h(H)

    return _forward(x, w1, b1, w2, b2, tile_m=tile_m, tile_h=tile_h)


def _reference(x, w1, b1, w2, b2):
    # Same numerics contract as the kernel: bf16 MXU inputs, f32 accumulation,
    # f32 bias / tanh-GELU / residual.  (PyTorch's default erf GELU and f32
    # matmuls differ slightly; the bf16 + tanh contract is intentional.)
    xf = x.astype(jnp.float32)
    h = jnp.dot(x.astype(jnp.bfloat16), w1.astype(jnp.bfloat16),
                preferred_element_type=jnp.float32) + b1.astype(jnp.float32)
    h = jax.nn.gelu(h, approximate=True)
    y = jnp.dot(h.astype(jnp.bfloat16), w2.astype(jnp.bfloat16),
                preferred_element_type=jnp.float32) + b2.astype(jnp.float32)
    return (xf + y).astype(x.dtype)


if __name__ == "__main__":
    # Small ViT-like shapes: batch=2, seq=100 (not a multiple of the row tile,
    # so the M-padding path is exercised), embed dim=32 (< 128, exercises the
    # lane-dense D padding), mlp hidden=4*32.
    B, N, D = 2, 100, 32
    H = 4 * D

    key = jax.random.PRNGKey(0)
    kx, k1, k2, k3, k4 = jax.random.split(key, 5)

    x = jax.random.normal(kx, (B, N, D), dtype=jnp.float32)
    w1 = jax.random.normal(k1, (D, H), dtype=jnp.float32) * 0.02
    b1 = jax.random.normal(k2, (H,), dtype=jnp.float32) * 0.01
    w2 = jax.random.normal(k3, (H, D), dtype=jnp.float32) * 0.02
    b2 = jax.random.normal(k4, (D,), dtype=jnp.float32) * 0.01

    out = residual_add_block(x, w1, b1, w2, b2)
    out = jax.block_until_ready(out)

    ref = _reference(x, w1, b1, w2, b2)
    assert out.shape == x.shape and out.dtype == x.dtype
    assert jnp.allclose(out, ref, atol=2e-3, rtol=2e-3), \
        float(jnp.max(jnp.abs(out - ref)))

    print("KERNEL_OK")
</pallas_src>

<mosaic_0001>
module attributes {stable_mosaic.version = 11 : i64} {
  func.func @_residual_mlp_kernel(%arg0: i32, %arg1: i32, %arg2: memref<128x128xf32, #tpu.memory_space<vmem>>, %arg3: memref<128x128xbf16, #tpu.memory_space<vmem>>, %arg4: memref<1x128xf32, #tpu.memory_space<vmem>>, %arg5: memref<128x128xbf16, #tpu.memory_space<vmem>>, %arg6: memref<1x128xf32, #tpu.memory_space<vmem>>, %arg7: memref<128x128xf32, #tpu.memory_space<vmem>>, %arg8: memref<128x128xf32, #tpu.memory_space<vmem>>) attributes {dimension_semantics = [#tpu.dimension_semantics<parallel>, #tpu.dimension_semantics<arbitrary>], iteration_bounds = array<i64: 2, 1>, scalar_prefetch = 0 : i64, scratch_operands = 1 : i64, tpu.core_type = #tpu.core_type<tc>, window_params = [{transform_indices = @transform_0, window_bounds = array<i64: 128, 128>}, {transform_indices = @transform_1, window_bounds = array<i64: 128, 128>}, {transform_indices = @transform_2, window_bounds = array<i64: 1, 128>}, {transform_indices = @transform_3, window_bounds = array<i64: 128, 128>}, {pipeline_mode = #tpu.pipeline_mode<synchronous>, transform_indices = @transform_4, window_bounds = array<i64: 1, 128>}, {transform_indices = @transform_5, window_bounds = array<i64: 128, 128>}]} {
    %c0_i32 = arith.constant 0 : i32
    %0 = arith.cmpi eq, %arg1, %c0_i32 : i32
    %1 = arith.extui %0 : i1 to i32
    %c0_i32_0 = arith.constant 0 : i32
    %2 = arith.cmpi ne, %1, %c0_i32_0 : i32
    scf.if %2 {
      %cst_19 = arith.constant 0.000000e+00 : f32
      %32 = vector.broadcast %cst_19 : f32 to vector<128x128xf32>
      %c0_20 = arith.constant 0 : index
      %c0_21 = arith.constant 0 : index
      %33 = vector.load %arg8[%c0_20, %c0_21] : memref<128x128xf32, #tpu.memory_space<vmem>>, vector<128x128xf32>
      tpu.vector_store %arg8[%c0_20, %c0_21], %32 {strides = array<i32>} : memref<128x128xf32, #tpu.memory_space<vmem>>, vector<128x128xf32>,
    } else {
    }
    %c0 = arith.constant 0 : index
    %c0_1 = arith.constant 0 : index
    %3 = vector.load %arg2[%c0, %c0_1] : memref<128x128xf32, #tpu.memory_space<vmem>>, vector<128x128xf32>
    %4 = arith.truncf %3 : vector<128x128xf32> to vector<128x128xbf16>
    %c0_2 = arith.constant 0 : index
    %c0_3 = arith.constant 0 : index
    %5 = vector.load %arg3[%c0_2, %c0_3] : memref<128x128xbf16, #tpu.memory_space<vmem>>, vector<128x128xbf16>
    %cst = arith.constant dense<0.000000e+00> : vector<128x128xf32>
    %6 = tpu.matmul %4, %5, %cst {dimension_numbers = #tpu.dot_dimension_numbers<[1], [0], [0], [1], [0, 0, 1, 1], [], []>} : vector<128x128xbf16>, vector<128x128xbf16>, vector<128x128xf32> -> vector<128x128xf32>
    %c0_4 = arith.constant 0 : index
    %c0_5 = arith.constant 0 : index
    %7 = vector.load %arg4[%c0_4, %c0_5] : memref<1x128xf32, #tpu.memory_space<vmem>>, vector<1x128xf32>
    %8 = vector.broadcast %7 : vector<1x128xf32> to vector<128x128xf32>
    %9 = arith.addf %6, %8 : vector<128x128xf32>
    %10 = arith.mulf %9, %9 : vector<128x128xf32>
    %11 = arith.mulf %9, %10 : vector<128x128xf32>
    %cst_6 = arith.constant 4.471500e-02 : f32
    %12 = vector.broadcast %cst_6 : f32 to vector<128x128xf32>
    %13 = arith.mulf %12, %11 : vector<128x128xf32>
    %14 = arith.addf %9, %13 : vector<128x128xf32>
    %cst_7 = arith.constant 0.797884583 : f32
    %15 = vector.broadcast %cst_7 : f32 to vector<128x128xf32>
    %16 = arith.mulf %15, %14 : vector<128x128xf32>
    %17 = math.tanh %16 : vector<128x128xf32>
    %cst_8 = arith.constant 1.000000e+00 : f32
    %18 = vector.broadcast %cst_8 : f32 to vector<128x128xf32>
    %19 = arith.addf %18, %17 : vector<128x128xf32>
    %cst_9 = arith.constant 5.000000e-01 : f32
    %20 = vector.broadcast %cst_9 : f32 to vector<128x128xf32>
    %21 = arith.mulf %20, %19 : vector<128x128xf32>
    %22 = arith.mulf %9, %21 : vector<128x128xf32>
    %c0_10 = arith.constant 0 : index
    %c0_11 = arith.constant 0 : index
    %23 = vector.load %arg8[%c0_10, %c0_11] : memref<128x128xf32, #tpu.memory_space<vmem>>, vector<128x128xf32>
    %24 = arith.truncf %22 : vector<128x128xf32> to vector<128x128xbf16>
    %c0_12 = arith.constant 0 : index
    %c0_13 = arith.constant 0 : index
    %25 = vector.load %arg5[%c0_12, %c0_13] : memref<128x128xbf16, #tpu.memory_space<vmem>>, vector<128x128xbf16>
    %cst_14 = arith.constant dense<0.000000e+00> : vector<128x128xf32>
    %26 = tpu.matmul %24, %25, %cst_14 {dimension_numbers = #tpu.dot_dimension_numbers<[1], [0], [0], [1], [0, 0, 1, 1], [], []>} : vector<128x128xbf16>, vector<128x128xbf16>, vector<128x128xf32> -> vector<128x128xf32>
    %27 = arith.addf %23, %26 : vector<128x128xf32>
    %c0_15 = arith.constant 0 : index
    %c0_16 = arith.constant 0 : index
    %28 = vector.load %arg8[%c0_15, %c0_16] : memref<128x128xf32, #tpu.memory_space<vmem>>, vector<128x128xf32>
    tpu.vector_store %arg8[%c0_15, %c0_16], %27 {strides = array<i32>} : memref<128x128xf32, #tpu.memory_space<vmem>>, vector<128x128xf32>,
    %c0_i32_17 = arith.constant 0 : i32
    %29 = arith.cmpi eq, %arg1, %c0_i32_17 : i32
    %30 = arith.extui %29 : i1 to i32
    %c0_i32_18 = arith.constant 0 : i32
    %31 = arith.cmpi ne, %30, %c0_i32_18 : i32
    scf.if %31 {
      %c0_19 = arith.constant 0 : index
      %c0_20 = arith.constant 0 : index
      %32 = vector.load %arg8[%c0_19, %c0_20] : memref<128x128xf32, #tpu.memory_space<vmem>>, vector<128x128xf32>
      %c0_21 = arith.constant 0 : index
      %c0_22 = arith.constant 0 : index
      %33 = vector.load %arg6[%c0_21, %c0_22] : memref<1x128xf32, #tpu.memory_space<vmem>>, vector<1x128xf32>
      %34 = vector.broadcast %33 : vector<1x128xf32> to vector<128x128xf32>
      %35 = arith.addf %32, %34 : vector<128x128xf32>
      %36 = arith.addf %35, %3 : vector<128x128xf32>
      %c0_23 = arith.constant 0 : index
      %c0_24 = arith.constant 0 : index
      %37 = vector.load %arg7[%c0_23, %c0_24] : memref<128x128xf32, #tpu.memory_space<vmem>>, vector<128x128xf32>
      tpu.vector_store %arg7[%c0_23, %c0_24], %36 {strides = array<i32>} : memref<128x128xf32, #tpu.memory_space<vmem>>, vector<128x128xf32>,
    } else {
    }
    return
  }
  func.func @transform_0(%arg0: i32, %arg1: i32) -> (i32, i32) {
    %c0_i32 = arith.constant 0 : i32
    %c0_i32_0 = arith.constant 0 : i32
    return %arg0, %c0_i32 : i32, i32
  }
  func.func @transform_1(%arg0: i32, %arg1: i32) -> (i32, i32) {
    %c0_i32 = arith.constant 0 : i32
    %c0_i32_0 = arith.constant 0 : i32
    return %c0_i32, %arg1 : i32, i32
  }
  func.func @transform_2(%arg0: i32, %arg1: i32) -> (i32, i32) {
    %c0_i32 = arith.constant 0 : i32
    %c0_i32_0 = arith.constant 0 : i32
    return %c0_i32, %arg1 : i32, i32
  }
  func.func @transform_3(%arg0: i32, %arg1: i32) -> (i32, i32) {
    %c0_i32 = arith.constant 0 : i32
    %c0_i32_0 = arith.constant 0 : i32
    return %arg1, %c0_i32 : i32, i32
  }
  func.func @transform_4(%arg0: i32, %arg1: i32) -> (i32, i32) {
    %c0_i32 = arith.constant 0 : i32
    %c0_i32_0 = arith.constant 0 : i32
    %c0_i32_1 = arith.constant 0 : i32
    return %c0_i32, %c0_i32_0 : i32, i32
  }
  func.func @transform_5(%arg0: i32, %arg1: i32) -> (i32, i32) {
    %c0_i32 = arith.constant 0 : i32
    %c0_i32_0 = arith.constant 0 : i32
    return %arg0, %c0_i32 : i32, i32
  }
}

</mosaic_0001>

<bundles_post_ra>
// kernel: _forward.1
= control target key start
LH: loop header
LB: loop body
LE: loop exit
PB: predicated region body
PF: predicated region fallthrough
CT: control target
= control target key end

     0   :  { %s1167_s18 = smov 0   ;;  %s1169_s19 = smov 0   ;;  %s1488_s0 = inlined_call_operand.vmem [shape: f32[256,128], index: 0, kind: input, shape index: {}]   ;;  %s1489_s1 = inlined_call_operand.vmem [shape: bf16[128,128], index: 1, kind: input, shape index: {}]   ;;  %s1490_s2 = inlined_call_operand.vmem [shape: f32[1,128], index: 2, kind: input, shape index: {}]   ;;  %s1491_s3 = inlined_call_operand.vmem [shape: bf16[128,128], index: 3, kind: input, shape index: {}]   ;;  %s1492_s4 = inlined_call_operand.vmem [shape: f32[1,128], index: 4, kind: input, shape index: {}]   ;;  %s1493_s5 = inlined_call_operand.vmem [shape: f32[256,128], index: 5, kind: output, shape index: {}]  }
   0x1   :  { %s1171_s20 = smov 0  }
   0x2 LB: > { %s27_s21 = sadd.s32 1, %s1131_s19  ;;  %p952_p0 = scmp.ge.s32.totalorder %s1135_s20, 1  ;;  %s1135_s20 = sphi %s1171_s20, %s15_s20   ;;  %s1131_s19 = sphi %s1169_s19, %s1495_s19   ;;  %s1127_s18 = sphi %s1167_s18, %s1494_s18  }
   0x3   : > { %p29_p1 = scmp.ge.s32.totalorder %s27_s21, 2  ;;  %p228_p2 = scmp.lt.s32.totalorder %s1135_s20, 3 }
   0x5   : > { %s1497_s21 = smov (%p29_p1, %s27_s21), 0  ;;  %p229_p3 = pnand %p952_p0, %p228_p2 }
   0x6   : > { %s953_s28 = sshll.u32 (!%p229_p3), %s1127_s18, 4 }
   0x7   : > { %232 = sbr.rel (%p229_p3) target bundleno = 404 (0x194), region = 40  ;;  %p269_p4 = scmp.lt.s32.totalorder (!%p229_p3), %s953_s28, 31 }
   0xc   : > { %v1030_v0 = vld [vmem:[%s1489_s1 + $0x38] sm:$0xff]  ;;  %v1029_v1 = vld [vmem:[%s1489_s1 + $0x30] sm:$0xff]  ;;  %v1028_v2 = vld [vmem:[%s1489_s1 + $0x28] sm:$0xff]  ;;  %s1499_s28 = smov (!%p269_p4, %s953_s28), 31 }
   0xd   : > { %405 = vmatpush.bf16.msra.mxu0 %v1030_v0  ;;  %1039 = vmatpush.bf16.msra.mxu2 %v1030_v0  ;;  %v1027_v3 = vld [vmem:[%s1489_s1 + $0x20] sm:$0xff]  ;;  %v1026_v4 = vld [vmem:[%s1489_s1 + $0x18] sm:$0xff]  ;;  %v1025_v5 = vld [vmem:[%s1489_s1 + $0x10] sm:$0xff]  ;;  %s954_s10 = sshll.u32 %s1499_s28, 3 }
   0xe   : > { %v1024_v6 = vld [vmem:[%s1489_s1 + $0x8] sm:$0xff]  ;;  %s1214_s15 = scalar_lea.vmem %s1488_s0, %s954_s10  ;;  %v1023_v7 = vld [vmem:[%s1489_s1] sm:$0xff]  ;;  %v1038_v32 = vld [vmem:[%s1491_s3 + $0x38] sm:$0xff]  ;;  %s1430_s23 = scalar_lea.vmem %s1493_s5, %s954_s10 }
   0xf   : > { %v1220_v8 = vld [vmem:[%s1214_s15] sm:$0xff]  ;;  %v1223_v9 = vld [vmem:[%s1214_s15 + $0x8] sm:$0xff]  ;;  %v1236_v14 = vld [vmem:[%s1214_s15 + $0x10] sm:$0xff]  ;;  %686 = vmatpush.bf16.msra.mxu1 %v1038_v32  ;;  %1047 = vmatpush.bf16.msra.mxu3 %v1038_v32 }
  0x10   : > { %v1226_v10 = vld [vmem:[%s1214_s15 + $0x40] sm:$0xff]  ;;  %v1229_v11 = vld [vmem:[%s1214_s15 + $0x48] sm:$0xff]  ;;  %v329_v12 = vpack.c.bf16 %v1223_v9, %v1220_v8  ;;  %v1239_v15 = vld [vmem:[%s1214_s15 + $0x18] sm:$0xff] }
  0x11   : > { %406 = vmatpush.bf16.msra.mxu0 %v1029_v1  ;;  %1040 = vmatpush.bf16.msra.mxu2 %v1029_v1  ;;  %v333_v13 = vpack.c.bf16 %v1229_v11, %v1226_v10  ;;  %v1242_v16 = vld [vmem:[%s1214_s15 + $0x50] sm:$0xff]  ;;  %v1245_v17 = vld [vmem:[%s1214_s15 + $0x58] sm:$0xff]  ;;  %v330_v18 = vpack.c.bf16 %v1239_v15, %v1236_v14  ;;  %v1252_v20 = vld [vmem:[%s1214_s15 + $0x20] sm:$0xff] }
  0x12   : > { %v334_v19 = vpack.c.bf16 %v1245_v17, %v1242_v16  ;;  %v1255_v21 = vld [vmem:[%s1214_s15 + $0x28] sm:$0xff]  ;;  %v1258_v22 = vld [vmem:[%s1214_s15 + $0x60] sm:$0xff]  ;;  %v1268_v26 = vld [vmem:[%s1214_s15 + $0x30] sm:$0xff] }
  0x13   : > { %v1261_v23 = vld [vmem:[%s1214_s15 + $0x68] sm:$0xff]  ;;  %v331_v24 = vpack.c.bf16 %v1255_v21, %v1252_v20  ;;  %v1271_v27 = vld [vmem:[%s1214_s15 + $0x38] sm:$0xff]  ;;  %v1274_v28 = vld [vmem:[%s1214_s15 + $0x70] sm:$0xff] }
  0x14   : > { %v335_v25 = vpack.c.bf16 %v1261_v23, %v1258_v22  ;;  %v1277_v29 = vld [vmem:[%s1214_s15 + $0x78] sm:$0xff]  ;;  %v332_v30 = vpack.c.bf16 %v1271_v27, %v1268_v26  ;;  %v1037_v33 = vld [vmem:[%s1491_s3 + $0x30] sm:$0xff]  ;;  %v1036_v34 = vld [vmem:[%s1491_s3 + $0x28] sm:$0xff] }
  0x15   : > { %407 = vmatpush.bf16.msra.mxu0 %v1028_v2  ;;  %1041 = vmatpush.bf16.msra.mxu2 %v1028_v2  ;;  %v336_v31 = vpack.c.bf16 %v1277_v29, %v1274_v28  ;;  %v1035_v35 = vld [vmem:[%s1491_s3 + $0x20] sm:$0xff]  ;;  %v1034_v36 = vld [vmem:[%s1491_s3 + $0x18] sm:$0xff]  ;;  %v1033_v37 = vld [vmem:[%s1491_s3 + $0x10] sm:$0xff] }
  0x16   : > { %687 = vmatpush.bf16.msra.mxu1 %v1037_v33  ;;  %1048 = vmatpush.bf16.msra.mxu3 %v1037_v33  ;;  %v1032_v38 = vld [vmem:[%s1491_s3 + $0x8] sm:$0xff]  ;;  %v1307_v39 = vld [vmem:[%s1490_s2] ss:$0 sm:$0xff] }
  0x17   : > { %v1031_v40 = vld [vmem:[%s1491_s3] sm:$0xff] }
  0x19   : > { %408 = vmatpush.bf16.msra.mxu0 %v1027_v3  ;;  %1042 = vmatpush.bf16.msra.mxu2 %v1027_v3 }
  0x1a   : > { %688 = vmatpush.bf16.msra.mxu1 %v1036_v34  ;;  %1049 = vmatpush.bf16.msra.mxu3 %v1036_v34 }
  0x1d   : > { %409 = vmatpush.bf16.msra.mxu0 %v1026_v4  ;;  %1043 = vmatpush.bf16.msra.mxu2 %v1026_v4 }
  0x1e   : > { %689 = vmatpush.bf16.msra.mxu1 %v1035_v35  ;;  %1050 = vmatpush.bf16.msra.mxu3 %v1035_v35 }
  0x21   : > { %410 = vmatpush.bf16.msra.mxu0 %v1025_v5  ;;  %1044 = vmatpush.bf16.msra.mxu2 %v1025_v5 }
  0x22   : > { %690 = vmatpush.bf16.msra.mxu1 %v1034_v36  ;;  %1051 = vmatpush.bf16.msra.mxu3 %v1034_v36 }
  0x25   : > { %411 = vmatpush.bf16.msra.mxu0 %v1024_v6  ;;  %1045 = vmatpush.bf16.msra.mxu2 %v1024_v6 }
  0x26   : > { %691 = vmatpush.bf16.msra.mxu1 %v1033_v37  ;;  %1052 = vmatpush.bf16.msra.mxu3 %v1033_v37 }
  0x29   : > { %412 = vmatpush.bf16.msra.mxu0 %v1023_v7  ;;  %1046 = vmatpush.bf16.msra.mxu2 %v1023_v7 }
  0x2a   : > { %692 = vmatpush.bf16.msra.mxu1 %v1032_v38  ;;  %1053 = vmatpush.bf16.msra.mxu3 %v1032_v38 }
  0x2c   : > { %413 = vmatmul.bf16.vlgmr.msra.gmra.mxu0 %v329_v12  ;;  %433 = vmatmul.bf16.vlgmr.msra.gmra.mxu2 %v333_v13 }
  0x2e   : > { %693 = vmatpush.bf16.msra.mxu1 %v1031_v40  ;;  %1054 = vmatpush.bf16.msra.mxu3 %v1031_v40 }
  0x3c   : > { %418 = vmatmul.bf16.gmra.mxu0 %v330_v18  ;;  %438 = vmatmul.bf16.gmra.mxu2 %v334_v19 }
  0x4c   : > { %423 = vmatmul.bf16.gmra.mxu0 %v331_v24  ;;  %443 = vmatmul.bf16.gmra.mxu2 %v335_v25 }
  0x5c   : > { %428 = vmatmul.bf16.gmra.mxu0 %v332_v30  ;;  %448 = vmatmul.bf16.gmra.mxu2 %v336_v31 }
  0xa9   : > { %v414_v41 = vpop.f32.mrf.mxu0 }
  0xaa   : > { %v1313_v42 = vadd.f32 %v1307_v39, %v414_v41 }
  0xac   : > { %v454_v43 = vmul.f32 %v1313_v42, %v1313_v42 }
  0xae   : > { %v470_v44 = vmul.f32 %v454_v43, %v1313_v42 }
  0xaf   : > { %v434_v45 = vpop.f32.mrf.mxu2 }
  0xb0   : > { %v486_v46 = vmul.f32 0.044715, %v470_v44  ;;  %v1319_v47 = vadd.f32 %v1307_v39, %v434_v45 }
  0xb1   : > { %v416_v48 = vpop.f32.mrf.mxu0 }
  0xb2   : > { %v502_v49 = vadd.f32 %v486_v46, %v1313_v42  ;;  %v462_v50 = vmul.f32 %v1319_v47, %v1319_v47  ;;  %v417_v51 = vadd.f32 %v1307_v39, %v416_v48 }
  0xb4   : > { %v478_v52 = vmul.f32 %v462_v50, %v1319_v47  ;;  %v455_v53 = vmul.f32 %v417_v51, %v417_v51  ;;  %v518_v54 = vmul.f32 0.7978846, %v502_v49 }
  0xb6   : > { %v494_v55 = vmul.f32 0.044715, %v478_v52  ;;  %v471_v56 = vmul.f32 %v455_v53, %v417_v51  ;;  %1081 = vtanh.f32 %v518_v54 }
  0xb7   : > { %v436_v57 = vpop.f32.mrf.mxu2 }
  0xb8   : > { %v510_v58 = vadd.f32 %v494_v55, %v1319_v47  ;;  %v487_v59 = vmul.f32 0.044715, %v471_v56  ;;  %v1328_v60 = vadd.f32 %v1307_v39, %v436_v57 }
  0xb9   : > { %v419_v61 = vpop.f32.mrf.mxu0 }
  0xba   : > { %v503_v62 = vadd.f32 %v487_v59, %v417_v51  ;;  %v463_v63 = vmul.f32 %v1328_v60, %v1328_v60  ;;  %v1333_v0 = vadd.f32 %v1307_v39, %v419_v61  ;;  %v526_v1 = vmul.f32 0.7978846, %v510_v58 }
  0xbc   : > { %v479_v2 = vmul.f32 %v463_v63, %v1328_v60  ;;  %v456_v3 = vmul.f32 %v1333_v0, %v1333_v0  ;;  %v519_v4 = vmul.f32 0.7978846, %v503_v62  ;;  %1083 = vtanh.f32 %v526_v1  ;;  %v1082_v5 = vpop.eup %1081 }
  0xbd   : > { %v550_v25 = vadd.f32 1.0, %v1082_v5 }
  0xbe   : > { %v495_v6 = vmul.f32 0.044715, %v479_v2  ;;  %v472_v7 = vmul.f32 %v456_v3, %v1333_v0  ;;  %1085 = vtanh.f32 %v519_v4 }
  0xbf   : > { %v439_v12 = vpop.f32.mrf.mxu2  ;;  %v566_v41 = vmul.f32 0.5, %v550_v25 }
  0xc0   : > { %v511_v13 = vadd.f32 %v495_v6, %v1328_v60  ;;  %v488_v18 = vmul.f32 0.044715, %v472_v7  ;;  %v1341_v19 = vadd.f32 %v1307_v39, %v439_v12 }
  0xc1   : > { %v421_v24 = vpop.f32.mrf.mxu0  ;;  %v582_v54 = vmul.f32 %v566_v41, %v1313_v42 }
  0xc2   : > { %v504_v30 = vadd.f32 %v488_v18, %v1333_v0  ;;  %v464_v31 = vmul.f32 %v1341_v19, %v1341_v19  ;;  %v1347_v32 = vadd.f32 %v1307_v39, %v421_v24  ;;  %v527_v33 = vmul.f32 0.7978846, %v511_v13  ;;  %v1084_v34 = vpop.eup %1083 }
  0xc3   : > { %v558_v48 = vadd.f32 1.0, %v1084_v34 }
  0xc4   : > { %v1086_v35 = vpop.eup %1085  ;;  %v480_v36 = vmul.f32 %v464_v31, %v1341_v19  ;;  %v457_v37 = vmul.f32 %v1347_v32, %v1347_v32  ;;  %1087 = vtanh.f32 %v527_v33  ;;  %v520_v38 = vmul.f32 0.7978846, %v504_v30 }
  0xc5   : > { %v551_v40 = vadd.f32 1.0, %v1086_v35  ;;  %v574_v1 = vmul.f32 0.5, %v558_v48 }
  0xc6   : > { %v496_v43 = vmul.f32 0.044715, %v480_v36  ;;  %v473_v44 = vmul.f32 %v457_v37, %v1347_v32  ;;  %1089 = vtanh.f32 %v520_v38 }
  0xc7   : > { %v441_v45 = vpop.f32.mrf.mxu2  ;;  %v567_v46 = vmul.f32 0.5, %v551_v40  ;;  %v590_v12 = vmul.f32 %v574_v1, %v1319_v47 }
  0xc8   : > { %v512_v49 = vadd.f32 %v496_v43, %v1341_v19  ;;  %v489_v50 = vmul.f32 0.044715, %v473_v44  ;;  %v1355_v52 = vadd.f32 %v1307_v39, %v441_v45 }
  0xc9   : > { %v424_v53 = vpop.f32.mrf.mxu0  ;;  %v583_v55 = vmul.f32 %v567_v46, %v417_v51 }
  0xca   : > { %v1088_v56 = vpop.eup %1087  ;;  %v505_v57 = vadd.f32 %v489_v50, %v1347_v32  ;;  %v465_v58 = vmul.f32 %v1355_v52, %v1355_v52  ;;  %v1362_v59 = vadd.f32 %v1307_v39, %v424_v53  ;;  %v528_v61 = vmul.f32 0.7978846, %v512_v49 }
  0xcb   : > { %v614_v62 = vpack.c.bf16 %v583_v55, %v582_v54  ;;  %v559_v63 = vadd.f32 1.0, %v1088_v56 }
  0xcc   : > { %v481_v2 = vmul.f32 %v465_v58, %v1355_v52  ;;  %v458_v3 = vmul.f32 %v1362_v59, %v1362_v59  ;;  %v521_v42 = vmul.f32 0.7978846, %v505_v57  ;;  %1091 = vtanh.f32 %v528_v61  ;;  %v1090_v4 = vpop.eup %1089 }
  0xcd   : > { %694 = vmatmul.bf16.vlgmr.msra.gmra.mxu1 %v614_v62  ;;  %v575_v51 = vmul.f32 0.5, %v559_v63  ;;  %v552_v33 = vadd.f32 1.0, %v1090_v4 }
  0xce   : > { %v497_v5 = vmul.f32 0.044715, %v481_v2  ;;  %v474_v6 = vmul.f32 %v458_v3, %v1362_v59  ;;  %1093 = vtanh.f32 %v521_v42 }
  0xcf   : > { %v444_v7 = vpop.f32.mrf.mxu2  ;;  %v591_v13 = vmul.f32 %v575_v51, %v1328_v60  ;;  %v568_v44 = vmul.f32 0.5, %v552_v33 }
  0xd0   : > { %v513_v18 = vadd.f32 %v497_v5, %v1355_v52  ;;  %v490_v24 = vmul.f32 0.044715, %v474_v6  ;;  %v1372_v25 = vadd.f32 %v1307_v39, %v444_v7 }
  0xd1   : > { %v426_v30 = vpop.f32.mrf.mxu0  ;;  %v618_v31 = vpack.c.bf16 %v591_v13, %v590_v12  ;;  %v584_v57 = vmul.f32 %v568_v44, %v1333_v0 }
  0xd2   : > { %v506_v34 = vadd.f32 %v490_v24, %v1362_v59  ;;  %v466_v35 = vmul.f32 %v1372_v25, %v1372_v25  ;;  %v1378_v36 = vadd.f32 %v1307_v39, %v426_v30  ;;  %v529_v47 = vmul.f32 0.7978846, %v513_v18  ;;  %v1092_v37 = vpop.eup %1091 }
  0xd3   : > { %714 = vmatmul.bf16.vlgmr.msra.gmra.mxu3 %v618_v31  ;;  %v560_v50 = vadd.f32 1.0, %v1092_v37 }
  0xd4   : > { %v1094_v60 = vpop.eup %1093  ;;  %v482_v38 = vmul.f32 %v466_v35, %v1372_v25  ;;  %v459_v40 = vmul.f32 %v1378_v36, %v1378_v36  ;;  %1095 = vtanh.f32 %v529_v47  ;;  %v522_v41 = vmul.f32 0.7978846, %v506_v34 }
  0xd5   : > { %v553_v43 = vadd.f32 1.0, %v1094_v60  ;;  %v576_v51 = vmul.f32 0.5, %v560_v50 }
  0xd6   : > { %v498_v45 = vmul.f32 0.044715, %v482_v38  ;;  %v475_v46 = vmul.f32 %v459_v40, %v1378_v36  ;;  %1097 = vtanh.f32 %v522_v41 }
  0xd7   : > { %v446_v48 = vpop.f32.mrf.mxu2  ;;  %v569_v49 = vmul.f32 0.5, %v553_v43  ;;  %v592_v18 = vmul.f32 %v576_v51, %v1341_v19 }
  0xd8   : > { %v514_v53 = vadd.f32 %v498_v45, %v1372_v25  ;;  %v491_v54 = vmul.f32 0.044715, %v475_v46  ;;  %v1386_v55 = vadd.f32 %v1307_v39, %v446_v48 }
  0xd9   : > { %v429_v56 = vpop.f32.mrf.mxu0  ;;  %v585_v58 = vmul.f32 %v569_v49, %v1347_v32 }
  0xda   : > { %v1096_v61 = vpop.eup %1095  ;;  %v507_v62 = vadd.f32 %v491_v54, %v1378_v36  ;;  %v467_v63 = vmul.f32 %v1386_v55, %v1386_v55  ;;  %v1394_v1 = vadd.f32 %v1307_v39, %v429_v56  ;;  %v530_v2 = vmul.f32 0.7978846, %v514_v53 }
  0xdb   : > { %v615_v3 = vpack.c.bf16 %v585_v58, %v584_v57  ;;  %v561_v42 = vadd.f32 1.0, %v1096_v61 }
  0xdc   : > { %v483_v4 = vmul.f32 %v467_v63, %v1386_v55  ;;  %v460_v0 = vmul.f32 %v1394_v1, %v1394_v1  ;;  %v523_v5 = vmul.f32 0.7978846, %v507_v62  ;;  %1099 = vtanh.f32 %v530_v2  ;;  %v1098_v6 = vpop.eup %1097 }
  0xdd   : > { %699 = vmatmul.bf16.gmra.mxu1 %v615_v3  ;;  %v577_v32 = vmul.f32 0.5, %v561_v42  ;;  %v554_v47 = vadd.f32 1.0, %v1098_v6 }
  0xde   : > { %v499_v7 = vmul.f32 0.044715, %v483_v4  ;;  %v476_v12 = vmul.f32 %v460_v0, %v1394_v1  ;;  %1101 = vtanh.f32 %v523_v5 }
  0xdf   : > { %v449_v13 = vpop.f32.mrf.mxu2  ;;  %v593_v24 = vmul.f32 %v577_v32, %v1355_v52  ;;  %v570_v46 = vmul.f32 0.5, %v554_v47 }
  0xe0   : > { %v515_v30 = vadd.f32 %v499_v7, %v1386_v55  ;;  %v492_v31 = vmul.f32 0.044715, %v476_v12  ;;  %v1404_v33 = vadd.f32 %v1307_v39, %v449_v13 }
  0xe1   : > { %v431_v34 = vpop.f32.mrf.mxu0  ;;  %v619_v35 = vpack.c.bf16 %v593_v24, %v592_v18  ;;  %v586_v61 = vmul.f32 %v570_v46, %v1362_v59  ;;  %v1422_v46 = vld [vmem:[%s1492_s4] ss:$0 sm:$0xff] }
  0xe2   : > { %v508_v37 = vadd.f32 %v492_v31, %v1394_v1  ;;  %v468_v60 = vmul.f32 %v1404_v33, %v1404_v33  ;;  %v432_v38 = vadd.f32 %v1307_v39, %v431_v34  ;;  %v531_v40 = vmul.f32 0.7978846, %v515_v30  ;;  %v1100_v19 = vpop.eup %1099 }
  0xe3   : > { %719 = vmatmul.bf16.gmra.mxu3 %v619_v35  ;;  %v562_v54 = vadd.f32 1.0, %v1100_v19 }
  0xe4   : > { %v1102_v52 = vpop.eup %1101  ;;  %v484_v41 = vmul.f32 %v468_v60, %v1404_v33  ;;  %v461_v43 = vmul.f32 %v432_v38, %v432_v38  ;;  %1103 = vtanh.f32 %v531_v40  ;;  %v524_v44 = vmul.f32 0.7978846, %v508_v37 }
  0xe5   : > { %v555_v45 = vadd.f32 1.0, %v1102_v52  ;;  %v578_v0 = vmul.f32 0.5, %v562_v54 }
  0xe6   : > { %v500_v48 = vmul.f32 0.044715, %v484_v41  ;;  %v477_v49 = vmul.f32 %v461_v43, %v432_v38  ;;  %1105 = vtanh.f32 %v524_v44 }
  0xe7   : > { %v451_v50 = vpop.f32.mrf.mxu2  ;;  %v571_v53 = vmul.f32 0.5, %v555_v45 }
  0xe8   : > { %v516_v56 = vadd.f32 %v500_v48, %v1404_v33  ;;  %v493_v57 = vmul.f32 0.044715, %v477_v49  ;;  %v452_v58 = vadd.f32 %v1307_v39, %v451_v50  ;;  %v594_v39 = vmul.f32 %v578_v0, %v1372_v25 }
  0xe9   : > { %v587_v62 = vmul.f32 %v571_v53, %v1378_v36 }
  0xea   : > { %v1104_v63 = vpop.eup %1103  ;;  %v509_v2 = vadd.f32 %v493_v57, %v432_v38  ;;  %v469_v3 = vmul.f32 %v452_v58, %v452_v58  ;;  %v532_v42 = vmul.f32 0.7978846, %v516_v56 }
  0xeb   : > { %v616_v51 = vpack.c.bf16 %v587_v62, %v586_v61  ;;  %v563_v4 = vadd.f32 1.0, %v1104_v63 }
  0xec   : > { %v485_v5 = vmul.f32 %v469_v3, %v452_v58  ;;  %v525_v32 = vmul.f32 0.7978846, %v509_v2  ;;  %1107 = vtanh.f32 %v532_v42  ;;  %v1106_v7 = vpop.eup %1105 }
  0xed   : > { %704 = vmatmul.bf16.gmra.mxu1 %v616_v51  ;;  %v579_v6 = vmul.f32 0.5, %v563_v4  ;;  %v556_v18 = vadd.f32 1.0, %v1106_v7 }
  0xee   : > { %v501_v12 = vmul.f32 0.044715, %v485_v5  ;;  %1109 = vtanh.f32 %v525_v32 }
  0xef   : > { %v595_v59 = vmul.f32 %v579_v6, %v1386_v55  ;;  %v572_v35 = vmul.f32 0.5, %v556_v18 }
  0xf0   : > { %v517_v36 = vadd.f32 %v501_v12, %v452_v58 }
  0xf1   : > { %v620_v13 = vpack.c.bf16 %v595_v59, %v594_v39  ;;  %v588_v60 = vmul.f32 %v572_v35, %v1394_v1 }
  0xf2   : > { %v533_v24 = vmul.f32 0.7978846, %v517_v36  ;;  %v1108_v30 = vpop.eup %1107 }
  0xf3   : > { %724 = vmatmul.bf16.gmra.mxu3 %v620_v13  ;;  %v564_v37 = vadd.f32 1.0, %v1108_v30 }
  0xf4   : > { %v1110_v31 = vpop.eup %1109  ;;  %1111 = vtanh.f32 %v533_v24 }
  0xf5   : > { %v557_v34 = vadd.f32 1.0, %v1110_v31  ;;  %v580_v55 = vmul.f32 0.5, %v564_v37 }
  0xf7   : > { %v573_v47 = vmul.f32 0.5, %v557_v34  ;;  %v596_v43 = vmul.f32 %v580_v55, %v1404_v33 }
  0xf9   : > { %v589_v40 = vmul.f32 %v573_v47, %v432_v38 }
  0xfa   : > { %v1112_v19 = vpop.eup %1111 }
  0xfb   : > { %v617_v25 = vpack.c.bf16 %v589_v40, %v588_v60  ;;  %v565_v52 = vadd.f32 1.0, %v1112_v19 }
  0xfd   : > { %709 = vmatmul.bf16.gmra.mxu1 %v617_v25  ;;  %v581_v41 = vmul.f32 0.5, %v565_v52 }
  0xff   : > { %v597_v44 = vmul.f32 %v581_v41, %v452_v58 }
 0x101   : > { %v621_v45 = vpack.c.bf16 %v597_v44, %v596_v43 }
 0x103   : > { %729 = vmatmul.bf16.gmra.mxu3 %v621_v45 }
 0x14a   : > { %v695_v48 = vpop.f32.mrf.mxu1 }
 0x14b   : > { %v790_v1 = vadd.f32 %v1422_v46, %v695_v48 }
 0x14d   : > { %v806_v33 = vadd.f32 %v790_v1, %v1220_v8 }
 0x14f   : > { %822 = vst [vmem:[%s1430_s23] sm:$0xff] %v806_v33 }
 0x152   : > { %v697_v38 = vpop.f32.mrf.mxu1 }
 0x153   : > { %v791_v49 = vadd.f32 %v1422_v46, %v697_v38 }
 0x155   : > { %v807_v50 = vadd.f32 %v791_v49, %v1223_v9 }
 0x156   : > { %v715_v53 = vpop.f32.mrf.mxu3 }
 0x157   : > { %823 = vst [vmem:[%s1430_s23 + $0x8] sm:$0xff] %v807_v50  ;;  %v798_v54 = vadd.f32 %v1422_v46, %v715_v53 }
 0x159   : > { %v814_v56 = vadd.f32 %v798_v54, %v1226_v10 }
 0x15a   : > { %v700_v57 = vpop.f32.mrf.mxu1 }
 0x15b   : > { %830 = vst [vmem:[%s1430_s23 + $0x40] sm:$0xff] %v814_v56  ;;  %v792_v58 = vadd.f32 %v1422_v46, %v700_v57 }
 0x15d   : > { %v808_v8 = vadd.f32 %v792_v58, %v1236_v14 }
 0x15e   : > { %v717_v61 = vpop.f32.mrf.mxu3 }
 0x15f   : > { %824 = vst [vmem:[%s1430_s23 + $0x10] sm:$0xff] %v808_v8  ;;  %v799_v62 = vadd.f32 %v1422_v46, %v717_v61 }
 0x161   : > { %v815_v9 = vadd.f32 %v799_v62, %v1229_v11 }
 0x162   : > { %v702_v63 = vpop.f32.mrf.mxu1 }
 0x163   : > { %831 = vst [vmem:[%s1430_s23 + $0x48] sm:$0xff] %v815_v9  ;;  %v793_v2 = vadd.f32 %v1422_v46, %v702_v63 }
 0x165   : > { %v809_v10 = vadd.f32 %v793_v2, %v1239_v15 }
 0x166   : > { %v720_v3 = vpop.f32.mrf.mxu3 }
 0x167   : > { %825 = vst [vmem:[%s1430_s23 + $0x18] sm:$0xff] %v809_v10  ;;  %v800_v42 = vadd.f32 %v1422_v46, %v720_v3 }
 0x169   : > { %v816_v14 = vadd.f32 %v800_v42, %v1242_v16 }
 0x16a   : > { %v705_v51 = vpop.f32.mrf.mxu1 }
 0x16b   : > { %832 = vst [vmem:[%s1430_s23 + $0x50] sm:$0xff] %v816_v14  ;;  %v794_v4 = vadd.f32 %v1422_v46, %v705_v51 }
 0x16d   : > { %v810_v11 = vadd.f32 %v794_v4, %v1252_v20 }
 0x16e   : > { %v722_v0 = vpop.f32.mrf.mxu3 }
 0x16f   : > { %826 = vst [vmem:[%s1430_s23 + $0x20] sm:$0xff] %v810_v11  ;;  %v801_v5 = vadd.f32 %v1422_v46, %v722_v0 }
 0x171   : > { %v817_v15 = vadd.f32 %v801_v5, %v1245_v17 }
 0x172   : > { %v707_v32 = vpop.f32.mrf.mxu1 }
 0x173   : > { %833 = vst [vmem:[%s1430_s23 + $0x58] sm:$0xff] %v817_v15  ;;  %v795_v6 = vadd.f32 %v1422_v46, %v707_v32 }
 0x175   : > { %v811_v16 = vadd.f32 %v795_v6, %v1255_v21 }
 0x176   : > { %v725_v7 = vpop.f32.mrf.mxu3 }
 0x177   : > { %827 = vst [vmem:[%s1430_s23 + $0x28] sm:$0xff] %v811_v16  ;;  %v802_v12 = vadd.f32 %v1422_v46, %v725_v7 }
 0x179   : > { %v818_v20 = vadd.f32 %v802_v12, %v1258_v22 }
 0x17a   : > { %v710_v39 = vpop.f32.mrf.mxu1 }
 0x17b   : > { %834 = vst [vmem:[%s1430_s23 + $0x60] sm:$0xff] %v818_v20  ;;  %v796_v59 = vadd.f32 %v1422_v46, %v710_v39 }
 0x17d   : > { %v812_v17 = vadd.f32 %v796_v59, %v1268_v26 }
 0x17e   : > { %v727_v36 = vpop.f32.mrf.mxu3 }
 0x17f   : > { %828 = vst [vmem:[%s1430_s23 + $0x30] sm:$0xff] %v812_v17  ;;  %v803_v13 = vadd.f32 %v1422_v46, %v727_v36 }
 0x181   : > { %v819_v21 = vadd.f32 %v803_v13, %v1261_v23 }
 0x182   : > { %v712_v18 = vpop.f32.mrf.mxu1 }
 0x183   : > { %835 = vst [vmem:[%s1430_s23 + $0x68] sm:$0xff] %v819_v21  ;;  %v797_v24 = vadd.f32 %v1422_v46, %v712_v18 }
 0x185   : > { %v813_v22 = vadd.f32 %v797_v24, %v1271_v27 }
 0x186   : > { %v730_v30 = vpop.f32.mrf.mxu3 }
 0x187   : > { %829 = vst [vmem:[%s1430_s23 + $0x38] sm:$0xff] %v813_v22  ;;  %v804_v31 = vadd.f32 %v1422_v46, %v730_v30 }
 0x189   : > { %v820_v34 = vadd.f32 %v804_v31, %v1274_v28 }
 0x18b   : > { %836 = vst [vmem:[%s1430_s23 + $0x70] sm:$0xff] %v820_v34 }
 0x18e   : > { %v732_v26 = vpop.f32.mrf.mxu3 }
 0x18f   : > { %v805_v35 = vadd.f32 %v1422_v46, %v732_v26 }
 0x191   : > { %v821_v47 = vadd.f32 %v805_v35, %v1277_v29 }
 0x193   : > { %837 = vst [vmem:[%s1430_s23 + $0x78] sm:$0xff] %v821_v47 }
 0x194 PF: > { %s15_s20 = sadd.s32 1, %s1135_s20   ;;  %s1494_s18 = smov %s1131_s19 }
 0x195   : > { %p12_p5 = scmp.ge.s32.totalorder %s15_s20, 4   ;;  %s1495_s19 = smov %s1497_s21 }
 0x197   :  { %14 = sbr.rel (!%p12_p5) target bundleno = 2 (0x2), region = 87 }

</bundles_post_ra>
